<compile_context>
chip_gen: v7x
topology: tpu7x:2x2x1
jax: 0.10.0
libtpu: 0.0.40
codegen_flags: <defaults>
</compile_context>

<pallas_src>
import functools

import jax
import jax.numpy as jnp
from jax.experimental import pallas as pl
from jax.experimental.pallas import tpu as pltpu

BN_EPS = 1e-5
TARGET_BLOCK_BYTES = 2 << 20          # ~2 MiB x-blocks (roofline sweet spot)
LANE_TILE_CAP = 16384                 # bounds in-kernel unroll of chunk adds
VMEM_LIMIT_BYTES = 48 * 1024 * 1024   # explicit; safe on v5e/v6e/v7x


# --------------------------------------------------------------------------
# Tile selection: (row_tile mult-of-8 or ==R, lane_tile mult-of-128)
# --------------------------------------------------------------------------
def _choose_tiles(R, L, itemsize=4):
    l128 = pl.cdiv(L, 128) * 128
    row = R if R <= 8 else 8
    lane = (TARGET_BLOCK_BYTES // (row * itemsize)) // 128 * 128
    lane = max(128, min(lane, l128, LANE_TILE_CAP))
    if lane >= l128 and R > 8:
        # whole L fits in one lane tile -> spend remaining budget on rows
        lane = l128
        row_cap = max(8, (TARGET_BLOCK_BYTES // (lane * itemsize)) // 8 * 8)
        row = max(8, min((R // 8) * 8, row_cap, 1024))
    return row, lane


# --------------------------------------------------------------------------
# Stage 1: tiled GAP of |x| over L -> (R, 128) lane-dense partial sums
# --------------------------------------------------------------------------
def _gap_kernel(x_ref, acc_ref, *, l_tile, n_chunks, true_l, ragged_l):
    l = pl.program_id(1)

    @pl.when(l == 0)
    def _():
        acc_ref[...] = jnp.zeros_like(acc_ref)

    ax = jnp.abs(x_ref[...].astype(jnp.float32))          # (row, l_tile)
    if ragged_l:
        col = l * l_tile + jax.lax.broadcasted_iota(jnp.int32, ax.shape, 1)
        ax = jnp.where(col < true_l, ax, 0.0)

    # VPU-only, lane-dense accumulation: fold l_tile into 128-wide chunks.
    part = acc_ref[...]
    for c in range(n_chunks):
        part = part + ax[:, c * 128:(c + 1) * 128]
    acc_ref[...] = part


# --------------------------------------------------------------------------
# Stage 3: elementwise new_soft_thresholding (t broadcast per row)
# --------------------------------------------------------------------------
def _threshold_kernel(x_ref, t_ref, o_ref):
    x = x_ref[...].astype(jnp.float32)                    # (row, lane)
    t = t_ref[...].astype(jnp.float32)                    # (row, 1) -> broadcast
    o = x + 0.5 * (jnp.sqrt((x - t) ** 2 + 0.003)
                   - jnp.sqrt((x + t) ** 2 + 0.003))
    o_ref[...] = o.astype(o_ref.dtype)


# --------------------------------------------------------------------------
# Stage 2: tiny fc stack in plain JAX (C is tiny; MXU util would be <1%)
# --------------------------------------------------------------------------
def _fc_stack(avg, w1, b1, gamma, beta, w2, b2):
    z = avg @ w1.T + b1
    mu = jnp.mean(z, axis=0, keepdims=True)
    var = jnp.mean((z - mu) ** 2, axis=0, keepdims=True)  # biased (training) var
    z = (z - mu) * jax.lax.rsqrt(var + BN_EPS) * gamma + beta
    z = jnp.maximum(z, 0.0)
    z = z @ w2.T + b2
    return jax.nn.sigmoid(z)


def shrinkage(x, w1, b1, gamma, beta, w2, b2):
    """x: (N, C, L); fc-stack params. Returns (N, C, L)."""
    N, C, L = x.shape
    R = N * C
    row, lane = _choose_tiles(R, L)
    grid = (pl.cdiv(R, row), pl.cdiv(L, lane))
    ragged_l = (L % lane) != 0
    n_chunks = lane // 128

    x2 = x.reshape(R, L)                                   # free (row-major)

    # ---- Stage 1: GAP(|x|) partial sums, rows parallel / L arbitrary -------
    partials = pl.pallas_call(
        functools.partial(_gap_kernel, l_tile=lane, n_chunks=n_chunks,
                          true_l=L, ragged_l=ragged_l),
        out_shape=jax.ShapeDtypeStruct((R, 128), jnp.float32),
        grid=grid,
        in_specs=[pl.BlockSpec((row, lane), lambda r, l: (r, l))],
        out_specs=pl.BlockSpec((row, 128), lambda r, l: (r, 0)),
        compiler_params=pltpu.CompilerParams(
            dimension_semantics=("parallel", "arbitrary"),
            vmem_limit_bytes=VMEM_LIMIT_BYTES),
    )(x2)
    avg = (jnp.sum(partials, axis=-1) * (1.0 / L)).reshape(N, C)   # (N, C)

    # ---- Stage 2: fc / BN / ReLU / fc / Sigmoid -----------------------------
    s = _fc_stack(avg, w1, b1, gamma, beta, w2, b2)        # (N, C)
    t2 = (avg * s).reshape(R, 1).astype(jnp.float32)       # per-row threshold

    # ---- Stage 3: streaming thresholding, fully parallel grid ---------------
    out2 = pl.pallas_call(
        _threshold_kernel,
        out_shape=jax.ShapeDtypeStruct((R, L), x.dtype),
        grid=grid,
        in_specs=[pl.BlockSpec((row, lane), lambda r, l: (r, l)),
                  pl.BlockSpec((row, 1), lambda r, l: (r, 0))],
        out_specs=pl.BlockSpec((row, lane), lambda r, l: (r, l)),
        compiler_params=pltpu.CompilerParams(
            dimension_semantics=("parallel", "parallel"),
            vmem_limit_bytes=VMEM_LIMIT_BYTES),
    )(x2, t2)
    return out2.reshape(N, C, L)


# --------------------------------------------------------------------------
# Pure-JAX reference (identical semantics) for validation
# --------------------------------------------------------------------------
def shrinkage_ref(x, w1, b1, gamma, beta, w2, b2):
    avg = jnp.mean(jnp.abs(x), axis=-1)
    z = avg @ w1.T + b1
    mu = jnp.mean(z, axis=0, keepdims=True)
    var = jnp.mean((z - mu) ** 2, axis=0, keepdims=True)
    z = (z - mu) / jnp.sqrt(var + BN_EPS) * gamma + beta
    z = jnp.maximum(z, 0.0)
    z = z @ w2.T + b2
    s = jax.nn.sigmoid(z)
    t = (avg * s)[:, :, None]
    return x + 0.5 * (jnp.sqrt((x - t) ** 2 + 0.003)
                      - jnp.sqrt((x + t) ** 2 + 0.003))


def _make_params(key, C):
    k1, kb1, k2, kb2 = jax.random.split(key, 4)
    bound = 1.0 / (C ** 0.5)
    w1 = jax.random.uniform(k1, (C, C), jnp.float32, -bound, bound)
    b1 = jax.random.uniform(kb1, (C,), jnp.float32, -bound, bound)
    w2 = jax.random.uniform(k2, (C, C), jnp.float32, -bound, bound)
    b2 = jax.random.uniform(kb2, (C,), jnp.float32, -bound, bound)
    gamma = jnp.ones((C,), jnp.float32)
    beta = jnp.zeros((C,), jnp.float32)
    return w1, b1, gamma, beta, w2, b2


if __name__ == "__main__":
    key = jax.random.PRNGKey(0)
    kx1, kp1, kx2, kp2 = jax.random.split(key, 4)

    # Test 1: aligned shapes (batch=2, channels=8, seq=512).
    N, C, L = 2, 8, 512
    x = jax.random.normal(kx1, (N, C, L), dtype=jnp.float32)
    params = _make_params(kp1, C)
    out = jax.block_until_ready(jax.jit(shrinkage)(x, *params))
    ref = shrinkage_ref(x, *params)
    assert out.shape == (N, C, L)
    assert jnp.allclose(out, ref, atol=1e-4, rtol=1e-4), "mismatch (aligned)"

    # Test 2: ragged L (not a multiple of 128) exercises cdiv grid + masking.
    N2, C2, L2 = 2, 4, 200
    x2 = jax.random.normal(kx2, (N2, C2, L2), dtype=jnp.float32)
    params2 = _make_params(kp2, C2)
    out2 = jax.block_until_ready(jax.jit(shrinkage)(x2, *params2))
    ref2 = shrinkage_ref(x2, *params2)
    assert out2.shape == (N2, C2, L2)
    assert jnp.allclose(out2, ref2, atol=1e-4, rtol=1e-4), "mismatch (ragged)"

    print("KERNEL_OK")
</pallas_src>

<mosaic_0001>
module attributes {stable_mosaic.version = 11 : i64} {
  func.func @_gap_kernel(%arg0: i32, %arg1: i32, %arg2: memref<16x512xf32, #tpu.memory_space<vmem>>, %arg3: memref<16x128xf32, #tpu.memory_space<vmem>>) attributes {dimension_semantics = [#tpu.dimension_semantics<parallel>, #tpu.dimension_semantics<arbitrary>], iteration_bounds = array<i64: 1, 1>, scalar_prefetch = 0 : i64, scratch_operands = 0 : i64, tpu.core_type = #tpu.core_type<tc>, window_params = [{transform_indices = @transform_0, window_bounds = array<i64: 16, 512>}, {transform_indices = @transform_1, window_bounds = array<i64: 16, 128>}]} {
    %c0_i32 = arith.constant 0 : i32
    %0 = arith.cmpi eq, %arg1, %c0_i32 : i32
    %1 = arith.extui %0 : i1 to i32
    %c0_i32_0 = arith.constant 0 : i32
    %2 = arith.cmpi ne, %1, %c0_i32_0 : i32
    scf.if %2 {
      %cst = arith.constant 0.000000e+00 : f32
      %15 = vector.broadcast %cst : f32 to vector<16x128xf32>
      %c0_6 = arith.constant 0 : index
      %c0_7 = arith.constant 0 : index
      %16 = vector.load %arg3[%c0_6, %c0_7] : memref<16x128xf32, #tpu.memory_space<vmem>>, vector<16x128xf32>
      tpu.vector_store %arg3[%c0_6, %c0_7], %15 {strides = array<i32>} : memref<16x128xf32, #tpu.memory_space<vmem>>, vector<16x128xf32>,
    } else {
    }
    %c0 = arith.constant 0 : index
    %c0_1 = arith.constant 0 : index
    %3 = vector.load %arg2[%c0, %c0_1] : memref<16x512xf32, #tpu.memory_space<vmem>>, vector<16x512xf32>
    %4 = math.absf %3 : vector<16x512xf32>
    %c0_2 = arith.constant 0 : index
    %c0_3 = arith.constant 0 : index
    %5 = vector.load %arg3[%c0_2, %c0_3] : memref<16x128xf32, #tpu.memory_space<vmem>>, vector<16x128xf32>
    %6 = vector.extract_strided_slice %4 {offsets = [0, 0], sizes = [16, 128], strides = [1, 1]} : vector<16x512xf32> to vector<16x128xf32>
    %7 = arith.addf %5, %6 : vector<16x128xf32>
    %8 = vector.extract_strided_slice %4 {offsets = [0, 128], sizes = [16, 128], strides = [1, 1]} : vector<16x512xf32> to vector<16x128xf32>
    %9 = arith.addf %7, %8 : vector<16x128xf32>
    %10 = vector.extract_strided_slice %4 {offsets = [0, 256], sizes = [16, 128], strides = [1, 1]} : vector<16x512xf32> to vector<16x128xf32>
    %11 = arith.addf %9, %10 : vector<16x128xf32>
    %12 = vector.extract_strided_slice %4 {offsets = [0, 384], sizes = [16, 128], strides = [1, 1]} : vector<16x512xf32> to vector<16x128xf32>
    %13 = arith.addf %11, %12 : vector<16x128xf32>
    %c0_4 = arith.constant 0 : index
    %c0_5 = arith.constant 0 : index
    %14 = vector.load %arg3[%c0_4, %c0_5] : memref<16x128xf32, #tpu.memory_space<vmem>>, vector<16x128xf32>
    tpu.vector_store %arg3[%c0_4, %c0_5], %13 {strides = array<i32>} : memref<16x128xf32, #tpu.memory_space<vmem>>, vector<16x128xf32>,
    return
  }
  func.func @transform_0(%arg0: i32, %arg1: i32) -> (i32, i32) {
    %c0_i32 = arith.constant 0 : i32
    return %arg0, %arg1 : i32, i32
  }
  func.func @transform_1(%arg0: i32, %arg1: i32) -> (i32, i32) {
    %c0_i32 = arith.constant 0 : i32
    %c0_i32_0 = arith.constant 0 : i32
    return %arg0, %c0_i32 : i32, i32
  }
}

module attributes {stable_mosaic.version = 11 : i64} {
  func.func @_threshold_kernel(%arg0: i32, %arg1: i32, %arg2: memref<16x512xf32, #tpu.memory_space<vmem>>, %arg3: memref<16x1xf32, #tpu.memory_space<vmem>>, %arg4: memref<16x512xf32, #tpu.memory_space<vmem>>) attributes {dimension_semantics = [#tpu.dimension_semantics<parallel>, #tpu.dimension_semantics<parallel>], iteration_bounds = array<i64: 1, 1>, scalar_prefetch = 0 : i64, scratch_operands = 0 : i64, tpu.core_type = #tpu.core_type<tc>, window_params = [{transform_indices = @transform_0, window_bounds = array<i64: 16, 512>}, {transform_indices = @transform_1, window_bounds = array<i64: 16, 1>}, {transform_indices = @transform_2, window_bounds = array<i64: 16, 512>}]} {
    %c0 = arith.constant 0 : index
    %c0_0 = arith.constant 0 : index
    %0 = vector.load %arg2[%c0, %c0_0] : memref<16x512xf32, #tpu.memory_space<vmem>>, vector<16x512xf32>
    %c0_1 = arith.constant 0 : index
    %c0_2 = arith.constant 0 : index
    %1 = vector.load %arg3[%c0_1, %c0_2] : memref<16x1xf32, #tpu.memory_space<vmem>>, vector<16x1xf32>
    %2 = vector.broadcast %1 : vector<16x1xf32> to vector<16x512xf32>
    %3 = arith.subf %0, %2 : vector<16x512xf32>
    %4 = arith.mulf %3, %3 : vector<16x512xf32>
    %cst = arith.constant 3.000000e-03 : f32
    %5 = vector.broadcast %cst : f32 to vector<16x512xf32>
    %6 = arith.addf %4, %5 : vector<16x512xf32>
    %7 = math.sqrt %6 : vector<16x512xf32>
    %8 = vector.broadcast %1 : vector<16x1xf32> to vector<16x512xf32>
    %9 = arith.addf %0, %8 : vector<16x512xf32>
    %10 = arith.mulf %9, %9 : vector<16x512xf32>
    %cst_3 = arith.constant 3.000000e-03 : f32
    %11 = vector.broadcast %cst_3 : f32 to vector<16x512xf32>
    %12 = arith.addf %10, %11 : vector<16x512xf32>
    %13 = math.sqrt %12 : vector<16x512xf32>
    %14 = arith.subf %7, %13 : vector<16x512xf32>
    %cst_4 = arith.constant 5.000000e-01 : f32
    %15 = vector.broadcast %cst_4 : f32 to vector<16x512xf32>
    %16 = arith.mulf %15, %14 : vector<16x512xf32>
    %17 = arith.addf %0, %16 : vector<16x512xf32>
    %c0_5 = arith.constant 0 : index
    %c0_6 = arith.constant 0 : index
    %18 = vector.load %arg4[%c0_5, %c0_6] : memref<16x512xf32, #tpu.memory_space<vmem>>, vector<16x512xf32>
    tpu.vector_store %arg4[%c0_5, %c0_6], %17 {strides = array<i32>} : memref<16x512xf32, #tpu.memory_space<vmem>>, vector<16x512xf32>,
    return
  }
  func.func @transform_0(%arg0: i32, %arg1: i32) -> (i32, i32) {
    %c0_i32 = arith.constant 0 : i32
    return %arg0, %arg1 : i32, i32
  }
  func.func @transform_1(%arg0: i32, %arg1: i32) -> (i32, i32) {
    %c0_i32 = arith.constant 0 : i32
    %c0_i32_0 = arith.constant 0 : i32
    return %arg0, %c0_i32 : i32, i32
  }
  func.func @transform_2(%arg0: i32, %arg1: i32) -> (i32, i32) {
    %c0_i32 = arith.constant 0 : i32
    return %arg0, %arg1 : i32, i32
  }
}

</mosaic_0001>

<bundles_post_ra>
// kernel: shrinkage.2
= control target key start
LH: loop header
LB: loop body
LE: loop exit
PB: predicated region body
PF: predicated region fallthrough
CT: control target
= control target key end

     0   :  { %6 = vsyncpa [#allocation3], 0  ;;  %s89_s6 = smov [#allocation2]   ;;  %s120_s0 = inlined_call_operand.hbm [shape: f32[16,512], index: 0, kind: input, shape index: {}]   ;;  %s121_s1 = inlined_call_operand.vmem [shape: f32[16,128], index: 1, kind: output, shape index: {}]  }
   0x1   :  { %s12_s7 = sshll.u32 %s89_s6, 4  ;;  %s65_s10 = scalar_lea.hbm %s120_s0, 1024  ;;  %s13_s7 = int_to_ptr.vmem [resolvable:$true] %s12_s7 }
   0x2   :  { %p66_p0 = scmp.ne.s32.totalorder %s120_s0, %s65_s10  ;;  %p69_p1 = scmp.lt.u32.totalorder %s65_s10, %s120_s0 }
   0x4   :  { %p71_p2 = pnand %p69_p1, %p66_p0 }
   0x6   :  { %74 = shalt.err (!%p71_p2)
}
   0x7   :  { %s75_s15 = scalar_lea.vmem %s13_s7, 1024  ;;  %p80_p4 = scmp.lt.s32.totalorder %s13_s7, %s13_s7 }
   0x8   :  { %p76_p3 = scmp.ne.s32.totalorder %s13_s7, %s75_s15  ;;  %p81_p5 = scmp.lt.s32.totalorder %s75_s15, %s75_s15 }
   0xa   :  { %p82_p6 = por %p81_p5, %p80_p4 }
   0xc   :  { %p83_p7 = pnand %p82_p6, %p76_p3 }
   0xe   :  { %86 = shalt.err (!%p83_p7)
}
   0xf   :  { %s90_s16 = smov 512   ;;  %s91_s17 = smov 32  }
  0x10   :  { %18 = dma.hbm_to_vmem [thread:$0]  %s120_s0, 1024, %s13_s7, [#allocation3], %s90_s16, %s90_s16, %s91_s17  }
  0x11   :  { %87 = dma.done.wait [#allocation3], 1024  }
  0x12   :  { %88 = vsyncadd [#allocation3], 4294966272  ;;  %v28_v0 = vld [vmem:[#allocation2] sm:$0xff]  ;;  %v29_v1 = vld [vmem:[#allocation2 + $0x8] sm:$0xff] }
  0x13   :  { %v30_v2 = vld [vmem:[#allocation2 + $0x10] sm:$0xff]  ;;  %v36_v3 = vand.u32 2147483647, %v28_v0  ;;  %v37_v4 = vand.u32 2147483647, %v29_v1  ;;  %v32_v5 = vld [vmem:[#allocation2 + $0x20] sm:$0xff] }
  0x14   :  { %v31_v6 = vld [vmem:[#allocation2 + $0x18] sm:$0xff]  ;;  %v33_v7 = vld [vmem:[#allocation2 + $0x28] sm:$0xff]  ;;  %v34_v8 = vld [vmem:[#allocation2 + $0x30] sm:$0xff]  ;;  %v38_v9 = vand.u32 2147483647, %v30_v2 }
  0x15   :  { %v40_v10 = vand.u32 2147483647, %v32_v5  ;;  %v41_v11 = vand.u32 2147483647, %v33_v7  ;;  %v35_v12 = vld [vmem:[#allocation2 + $0x38] sm:$0xff]  ;;  %v48_v14 = vadd.f32 %v37_v4, %v36_v3 }
  0x16   :  { %v39_v13 = vand.u32 2147483647, %v31_v6  ;;  %v42_v15 = vand.u32 2147483647, %v34_v8  ;;  %v43_v17 = vand.u32 2147483647, %v35_v12 }
  0x17   :  { %v50_v16 = vadd.f32 %v48_v14, %v38_v9  ;;  %v49_v18 = vadd.f32 %v41_v11, %v40_v10 }
  0x19   :  { %v52_v19 = vadd.f32 %v50_v16, %v39_v13  ;;  %v51_v20 = vadd.f32 %v49_v18, %v42_v15 }
  0x1b   :  { %54 = vst [vmem:[%s121_s1] sm:$0xff] %v52_v19  ;;  %v53_v21 = vadd.f32 %v51_v20, %v43_v17 }
  0x1d   :  { %55 = vst [vmem:[%s121_s1 + $0x8] sm:$0xff] %v53_v21 }
  0x1e   :  { %60 = vsyncpa [#allocation3], 1 }

// kernel: shrinkage.3
= control target key start
LH: loop header
LB: loop body
LE: loop exit
PB: predicated region body
PF: predicated region fallthrough
CT: control target
= control target key end

     0   :  { %s561_s0 = inlined_call_operand.vmem [shape: f32[16,512], index: 0, kind: input, shape index: {}]   ;;  %s562_s1 = inlined_call_operand.vmem [shape: f32[16,1], index: 1, kind: input, shape index: {}]   ;;  %s563_s2 = inlined_call_operand.hbm [shape: f32[16,512], index: 2, kind: output, shape index: {}]  }
   0x1   :  { %v20_v0 = vld [vmem:[%s562_s1] sm:$0xff] }
   0x2   :  { %7 = vsyncpa [#allocation3], 0  ;;  %v301_v1 = vmov 0   ;;  %v21_v2 = vld [vmem:[%s562_s1 + $0x8] sm:$0xff]  ;;  %v329_v3 = vld [vmem:[%s561_s0] sm:$0xff] }
   0x3   :  { %244 = vset.pattern.permute.xlu0 %v301_v1  ;;  %v334_v4 = vld [vmem:[%s561_s0 + $0x8] sm:$0xff]  ;;  %v339_v5 = vld [vmem:[%s561_s0 + $0x10] sm:$0xff]  ;;  %v344_v6 = vld [vmem:[%s561_s0 + $0x18] sm:$0xff] }
   0x4   :  { %24 = vperm.xlu0 %244, %v20_v0   ;;  %v374_v31 = vld [vmem:[%s561_s0 + $0x20] sm:$0xff]  ;;  %v379_v32 = vld [vmem:[%s561_s0 + $0x28] sm:$0xff]  ;;  %v392_v35 = vld [vmem:[%s561_s0 + $0x30] sm:$0xff] }
   0x5   :  { %v397_v36 = vld [vmem:[%s561_s0 + $0x38] sm:$0xff]  ;;  %s302_s0 = smov [#allocation2]  }
   0x6   :  { %s229_s28 = sshll.u32 %s302_s0, 4  ;;  %s230_s28 = int_to_ptr.vmem [resolvable:$true] %s229_s28 }
   0x7   :  { %s277_s29 = scalar_lea.vmem %s230_s28, 1024  ;;  %p282_p1 = scmp.lt.s32.totalorder %s230_s28, %s230_s28 }
   0x8   :  { %29 = vperm.xlu0 %244, %v21_v2   ;;  %p278_p0 = scmp.ne.s32.totalorder %s230_s28, %s277_s29  ;;  %p283_p2 = scmp.lt.s32.totalorder %s277_s29, %s277_s29 }
   0xa   :  { %p284_p3 = por %p283_p2, %p282_p1 }
   0xc   :  { %p285_p4 = pnand %p284_p3, %p278_p0 }
  0x83   :  { %v25_v7 = vpop.permute.xlu0 %24 }
  0x84   :  { %v32_v8 = vsub.f32 %v329_v3, %v25_v7  ;;  %v33_v9 = vsub.f32 %v334_v4, %v25_v7  ;;  %v34_v10 = vsub.f32 %v339_v5, %v25_v7  ;;  %v35_v11 = vsub.f32 %v344_v6, %v25_v7 }
  0x85   :  { %v112_v12 = vadd.f32 %v25_v7, %v329_v3  ;;  %v113_v13 = vadd.f32 %v25_v7, %v334_v4  ;;  %v114_v14 = vadd.f32 %v25_v7, %v339_v5  ;;  %v115_v15 = vadd.f32 %v25_v7, %v344_v6 }
  0x86   :  { %v40_v16 = vmul.f32 %v32_v8, %v32_v8  ;;  %v41_v17 = vmul.f32 %v33_v9, %v33_v9  ;;  %v42_v18 = vmul.f32 %v34_v10, %v34_v10  ;;  %v43_v19 = vmul.f32 %v35_v11, %v35_v11 }
  0x87   :  { %v120_v20 = vmul.f32 %v112_v12, %v112_v12  ;;  %v121_v21 = vmul.f32 %v113_v13, %v113_v13  ;;  %v122_v26 = vmul.f32 %v114_v14, %v114_v14  ;;  %v123_v27 = vmul.f32 %v115_v15, %v115_v15  ;;  %v369_v30 = vpop.permute.xlu0 %29 }
  0x88   :  { %v354_v22 = vadd.f32 0.003, %v40_v16  ;;  %v356_v23 = vadd.f32 0.003, %v41_v17  ;;  %v358_v24 = vadd.f32 0.003, %v42_v18  ;;  %v36_v37 = vsub.f32 %v374_v31, %v369_v30 }
  0x89   :  { %v360_v25 = vadd.f32 0.003, %v43_v19  ;;  %v363_v28 = vadd.f32 0.003, %v120_v20  ;;  %v366_v29 = vadd.f32 0.003, %v121_v21  ;;  %v37_v38 = vsub.f32 %v379_v32, %v369_v30 }
  0x8a   :  { %245 = vrsqrt.f32 %v354_v22  ;;  %v382_v33 = vadd.f32 0.003, %v122_v26  ;;  %v384_v34 = vadd.f32 0.003, %v123_v27  ;;  %vm58_vm0 = vcmp.eq.f32.partialorder %v354_v22, inf }
  0x8b   :  { %247 = vrsqrt.f32 %v356_v23  ;;  %v61_v39 = vand.u32 2147483648, %v354_v22  ;;  %vm65_vm1 = vcmp.eq.f32.partialorder %v356_v23, inf  ;;  %v68_v40 = vand.u32 2147483648, %v356_v23 }
  0x8c   :  { %249 = vrsqrt.f32 %v358_v24  ;;  %vm60_vm2 = vcmp.eq.f32.partialorder %v354_v22, 0.0  ;;  %vm72_vm3 = vcmp.eq.f32.partialorder %v358_v24, inf  ;;  %v75_v41 = vand.u32 2147483648, %v358_v24 }
  0x8d   :  { %251 = vrsqrt.f32 %v360_v25  ;;  %vm79_vm4 = vcmp.eq.f32.partialorder %v360_v25, inf  ;;  %vm67_vm5 = vcmp.eq.f32.partialorder %v356_v23, 0.0  ;;  %vm74_vm6 = vcmp.eq.f32.partialorder %v358_v24, 0.0 }
  0x8e   :  { %253 = vrsqrt.f32 %v363_v28  ;;  %v82_v42 = vand.u32 2147483648, %v360_v25  ;;  %vm138_vm7 = vcmp.eq.f32.partialorder %v363_v28, inf  ;;  %v38_v43 = vsub.f32 %v392_v35, %v369_v30 }
  0x8f   :  { %255 = vrsqrt.f32 %v366_v29  ;;  %v39_v44 = vsub.f32 %v397_v36, %v369_v30  ;;  %vm140_vm8 = vcmp.eq.f32.partialorder %v363_v28, 0.0  ;;  %v141_v45 = vand.u32 2147483648, %v363_v28 }
  0x90   :  { %257 = vrsqrt.f32 %v382_v33  ;;  %vm145_vm9 = vcmp.eq.f32.partialorder %v366_v29, inf  ;;  %v44_v46 = vmul.f32 %v36_v37, %v36_v37  ;;  %vm81_vm10 = vcmp.eq.f32.partialorder %v360_v25, 0.0 }
  0x91   :  { %259 = vrsqrt.f32 %v384_v34  ;;  %vm147_vm11 = vcmp.eq.f32.partialorder %v366_v29, 0.0  ;;  %v148_v48 = vand.u32 2147483648, %v366_v29  ;;  %vm152_vm12 = vcmp.eq.f32.partialorder %v382_v33, inf }
  0x92   :  { %v155_v49 = vand.u32 2147483648, %v382_v33  ;;  %v45_v50 = vmul.f32 %v37_v38, %v37_v38  ;;  %vm154_vm13 = vcmp.eq.f32.partialorder %v382_v33, 0.0  ;;  %vm159_vm14 = vcmp.eq.f32.partialorder %v384_v34, inf }
  0x93   :  { %v46_v53 = vmul.f32 %v38_v43, %v38_v43  ;;  %v47_v54 = vmul.f32 %v39_v44, %v39_v44  ;;  %vm161_vm15 = vcmp.eq.f32.partialorder %v384_v34, 0.0  ;;  %v162_v57 = vand.u32 2147483648, %v384_v34 }
  0x94   :  { %v246_v47 = vpop.eup %245  ;;  %v434_v58 = vadd.f32 0.003, %v44_v46  ;;  %v116_v62 = vadd.f32 %v369_v30, %v374_v31  ;;  %v117_v63 = vadd.f32 %v369_v30, %v379_v32  ;;  %v448_v7 = vadd.f32 0.003, %v45_v50 }
  0x95   :  { %v248_v51 = vpop.eup %247  ;;  %v57_v52 = vmul.f32 %v246_v47, %v354_v22  ;;  %v118_v8 = vadd.f32 %v369_v30, %v392_v35  ;;  %v456_v12 = vadd.f32 0.003, %v46_v53  ;;  %v458_v13 = vadd.f32 0.003, %v47_v54 }
  0x96   :  { %v250_v55 = vpop.eup %249  ;;  %v64_v56 = vmul.f32 %v248_v51, %v356_v23  ;;  %261 = vrsqrt.f32 %v434_v58  ;;  %v124_v44 = vmul.f32 %v116_v62, %v116_v62  ;;  %v96_v62 = vand.u32 2147483648, %v448_v7 }
  0x97   :  { %v252_v59 = vpop.eup %251  ;;  %v59_v60 = vsel %vm58_vm0, %v354_v22, %v57_v52  ;;  %v71_v61 = vmul.f32 %v250_v55, %v358_v24  ;;  %263 = vrsqrt.f32 %v448_v7  ;;  %vm86_vm0 = vcmp.eq.f32.partialorder %v434_v58, inf }
  0x98   :  { %v254_v0 = vpop.eup %253  ;;  %v66_v1 = vsel %vm65_vm1, %v356_v23, %v64_v56  ;;  %v78_v2 = vmul.f32 %v252_v59, %v360_v25  ;;  %v62_v15 = vsel %vm60_vm2, %v61_v39, %v59_v60  ;;  %265 = vrsqrt.f32 %v456_v12 }
  0x99   :  { %v256_v9 = vpop.eup %255  ;;  %v73_v10 = vsel %vm72_vm3, %v358_v24, %v71_v61  ;;  %v137_v11 = vmul.f32 %v254_v0, %v363_v28  ;;  %v69_v19 = vsel %vm67_vm5, %v68_v40, %v66_v1  ;;  %267 = vrsqrt.f32 %v458_v13 }
  0x9a   :  { %v258_v14 = vpop.eup %257  ;;  %v80_v16 = vsel %vm79_vm4, %v360_v25, %v78_v2  ;;  %v144_v17 = vmul.f32 %v256_v9, %v366_v29  ;;  %v76_v20 = vsel %vm74_vm6, %v75_v41, %v73_v10  ;;  %v119_v25 = vadd.f32 %v369_v30, %v397_v36 }
  0x9b   :  { %v260_v18 = vpop.eup %259  ;;  %v139_v21 = vsel %vm138_vm7, %v363_v28, %v137_v11  ;;  %v151_v22 = vmul.f32 %v258_v14, %v382_v33  ;;  %v83_v23 = vsel %vm81_vm10, %v82_v42, %v80_v16  ;;  %v132_v54 = vadd.f32 0.003, %v124_v44 }
  0x9c   :  { %v142_v26 = vsel %vm140_vm8, %v141_v45, %v139_v21  ;;  %v146_v27 = vsel %vm145_vm9, %v366_v29, %v144_v17  ;;  %v158_v37 = vmul.f32 %v260_v18, %v384_v34  ;;  %v127_v51 = vmul.f32 %v119_v25, %v119_v25 }
  0x9d   :  { %v149_v24 = vsel %vm147_vm11, %v148_v48, %v146_v27  ;;  %v153_v38 = vsel %vm152_vm12, %v382_v33, %v151_v22  ;;  %v192_v28 = vsub.f32 %v62_v15, %v142_v26  ;;  %v125_v33 = vmul.f32 %v117_v63, %v117_v63 }
  0x9e   :  { %v156_v39 = vsel %vm154_vm13, %v155_v49, %v153_v38  ;;  %v160_v40 = vsel %vm159_vm14, %v384_v34, %v158_v37  ;;  %v193_v41 = vsub.f32 %v69_v19, %v149_v24  ;;  %v126_v34 = vmul.f32 %v118_v8, %v118_v8 }
  0x9f   :  { %v163_v29 = vsel %vm161_vm15, %v162_v57, %v160_v40  ;;  %v194_v42 = vsub.f32 %v76_v20, %v156_v39  ;;  %v200_v43 = vmul.f32 0.5, %v192_v28  ;;  %v133_v55 = vadd.f32 0.003, %v125_v33 }
  0xa0   :  { %v195_v45 = vsub.f32 %v83_v23, %v163_v29  ;;  %v201_v46 = vmul.f32 0.5, %v193_v41  ;;  %v262_v52 = vpop.eup %261  ;;  %v134_v56 = vadd.f32 0.003, %v126_v34  ;;  %v504_v57 = vadd.f32 0.003, %v127_v51 }
  0xa1   :  { %v202_v47 = vmul.f32 0.5, %v194_v42  ;;  %v208_v48 = vadd.f32 %v200_v43, %v329_v3  ;;  %v264_v3 = vpop.eup %263  ;;  %269 = vrsqrt.f32 %v132_v54  ;;  %vm88_vm1 = vcmp.eq.f32.partialorder %v434_v58, 0.0 }
  0xa2   :  { %v203_v49 = vmul.f32 0.5, %v195_v45  ;;  %v209_v50 = vadd.f32 %v201_v46, %v334_v4  ;;  %271 = vrsqrt.f32 %v133_v55  ;;  %v85_v4 = vmul.f32 %v262_v52, %v434_v58  ;;  %v266_v59 = vpop.eup %265 }
  0xa3   :  { %v210_v30 = vadd.f32 %v202_v47, %v339_v5  ;;  %216 = vst [vmem:[#allocation2] sm:$0xff] %v208_v48  ;;  %273 = vrsqrt.f32 %v134_v56  ;;  %v92_v5 = vmul.f32 %v264_v3, %v448_v7  ;;  %v89_v60 = vand.u32 2147483648, %v434_v58 }
  0xa4   :  { %v211_v53 = vadd.f32 %v203_v49, %v344_v6  ;;  %217 = vst [vmem:[#allocation2 + $0x8] sm:$0xff] %v209_v50  ;;  %275 = vrsqrt.f32 %v504_v57  ;;  %v268_v6 = vpop.eup %267  ;;  %v87_v61 = vsel %vm86_vm0, %v434_v58, %v85_v4  ;;  %vm93_vm2 = vcmp.eq.f32.partialorder %v448_v7, inf }
  0xa5   :  { %218 = vst [vmem:[#allocation2 + $0x10] sm:$0xff] %v210_v30  ;;  %vm95_vm3 = vcmp.eq.f32.partialorder %v448_v7, 0.0  ;;  %v94_v63 = vsel %vm93_vm2, %v448_v7, %v92_v5  ;;  %v99_v0 = vmul.f32 %v266_v59, %v456_v12  ;;  %vm100_vm4 = vcmp.eq.f32.partialorder %v456_v12, inf }
  0xa6   :  { %219 = vst [vmem:[#allocation2 + $0x18] sm:$0xff] %v211_v53  ;;  %vm102_vm5 = vcmp.eq.f32.partialorder %v456_v12, 0.0  ;;  %v103_v1 = vand.u32 2147483648, %v456_v12  ;;  %v106_v2 = vmul.f32 %v268_v6, %v458_v13  ;;  %vm107_vm6 = vcmp.eq.f32.partialorder %v458_v13, inf }
  0xa7   :  { %vm109_vm7 = vcmp.eq.f32.partialorder %v458_v13, 0.0  ;;  %v90_v58 = vsel %vm88_vm1, %v89_v60, %v87_v61  ;;  %v110_v8 = vand.u32 2147483648, %v458_v13  ;;  %vm166_vm8 = vcmp.eq.f32.partialorder %v132_v54, inf }
  0xa8   :  { %vm168_vm9 = vcmp.eq.f32.partialorder %v132_v54, 0.0  ;;  %v97_v9 = vsel %vm95_vm3, %v96_v62, %v94_v63  ;;  %v169_v10 = vand.u32 2147483648, %v132_v54  ;;  %vm173_vm10 = vcmp.eq.f32.partialorder %v133_v55, inf }
  0xa9   :  { %vm175_vm11 = vcmp.eq.f32.partialorder %v133_v55, 0.0  ;;  %v101_v14 = vsel %vm100_vm4, %v456_v12, %v99_v0  ;;  %v176_v16 = vand.u32 2147483648, %v133_v55  ;;  %vm180_vm12 = vcmp.eq.f32.partialorder %v134_v56, inf }
  0xaa   :  { %v108_v18 = vsel %vm107_vm6, %v458_v13, %v106_v2  ;;  %vm182_vm13 = vcmp.eq.f32.partialorder %v134_v56, 0.0  ;;  %v183_v20 = vand.u32 2147483648, %v134_v56  ;;  %vm187_vm14 = vcmp.eq.f32.partialorder %v504_v57, inf }
  0xab   :  { %v270_v7 = vpop.eup %269  ;;  %v190_v27 = vand.u32 2147483648, %v504_v57  ;;  %v104_v37 = vsel %vm102_vm5, %v103_v1, %v101_v14  ;;  %v111_v28 = vsel %vm109_vm7, %v110_v8, %v108_v18  ;;  %vm189_vm15 = vcmp.eq.f32.partialorder %v504_v57, 0.0 }
  0xac   :  { %v272_v11 = vpop.eup %271  ;;  %v165_v15 = vmul.f32 %v270_v7, %v132_v54 }
  0xad   :  { %v274_v17 = vpop.eup %273  ;;  %v172_v19 = vmul.f32 %v272_v11, %v133_v55 }
  0xae   :  { %v276_v21 = vpop.eup %275  ;;  %v167_v22 = vsel %vm166_vm8, %v132_v54, %v165_v15  ;;  %v179_v26 = vmul.f32 %v274_v17, %v134_v56 }
  0xaf   :  { %v170_v23 = vsel %vm168_vm9, %v169_v10, %v167_v22  ;;  %v174_v24 = vsel %vm173_vm10, %v133_v55, %v172_v19  ;;  %v186_v38 = vmul.f32 %v276_v21, %v504_v57 }
  0xb0   :  { %v177_v39 = vsel %vm175_vm11, %v176_v16, %v174_v24  ;;  %v181_v40 = vsel %vm180_vm12, %v134_v56, %v179_v26  ;;  %v196_v41 = vsub.f32 %v90_v58, %v170_v23 }
  0xb1   :  { %v184_v25 = vsel %vm182_vm13, %v183_v20, %v181_v40  ;;  %v188_v29 = vsel %vm187_vm14, %v504_v57, %v186_v38  ;;  %v197_v12 = vsub.f32 %v97_v9, %v177_v39 }
  0xb2   :  { %v191_v42 = vsel %vm189_vm15, %v190_v27, %v188_v29  ;;  %v198_v43 = vsub.f32 %v104_v37, %v184_v25  ;;  %v204_v44 = vmul.f32 0.5, %v196_v41 }
  0xb3   :  { %v199_v45 = vsub.f32 %v111_v28, %v191_v42  ;;  %v205_v46 = vmul.f32 0.5, %v197_v12 }
  0xb4   :  { %v206_v33 = vmul.f32 0.5, %v198_v43  ;;  %v212_v13 = vadd.f32 %v204_v44, %v374_v31 }
  0xb5   :  { %v207_v47 = vmul.f32 0.5, %v199_v45  ;;  %v213_v48 = vadd.f32 %v205_v46, %v379_v32 }
  0xb6   :  { %v214_v49 = vadd.f32 %v206_v33, %v392_v35  ;;  %220 = vst [vmem:[#allocation2 + $0x20] sm:$0xff] %v212_v13 }
  0xb7   :  { %v215_v50 = vadd.f32 %v207_v47, %v397_v36  ;;  %221 = vst [vmem:[#allocation2 + $0x28] sm:$0xff] %v213_v48 }
  0xb8   :  { %222 = vst [vmem:[#allocation2 + $0x30] sm:$0xff] %v214_v49 }
  0xb9   :  { %223 = vst [vmem:[#allocation2 + $0x38] sm:$0xff] %v215_v50 }
  0xba   :  { %288 = shalt.err (!%p285_p4)
}
  0xbb   :  { %s289_s4 = scalar_lea.hbm %s563_s2, 1024 }
  0xbc   :  { %p290_p5 = scmp.ne.s32.totalorder %s563_s2, %s289_s4  ;;  %p293_p6 = scmp.lt.u32.totalorder %s289_s4, %s563_s2 }
  0xbe   :  { %p295_p7 = pnand %p293_p6, %p290_p5 }
  0xc0   :  { %298 = shalt.err (!%p295_p7)
}
  0xc1   :  { %s303_s9 = smov 512   ;;  %s304_s10 = smov 32  }
  0xc2   :  { %235 = dma.vmem_to_hbm [thread:$0]  %s230_s28, 1024, %s563_s2, [#allocation3], %s303_s9, %s303_s9, %s304_s10  }
  0xc3   :  { %299 = dma.done.wait [#allocation3], 1024  }
  0xc4   :  { %300 = vsyncadd [#allocation3], 4294966272 }
  0xc5   :  { %239 = vsyncpa [#allocation3], 1 }

</bundles_post_ra>
